<compile_context>
chip_gen: v5e
topology: v5e:2x2
jax: 0.10.0
libtpu: 0.0.40
codegen_flags: <defaults>
</compile_context>

<pallas_src>
import functools

import jax
import jax.numpy as jnp
import numpy as np
from jax.experimental import pallas as pl
from jax.experimental.pallas import tpu as pltpu

NUM_HEADS = 8   # matches nn.MultiheadAttention(embed_dim=input_dim, num_heads=8)
_LANE = 128


# --------------------------- hardware-aware budgets --------------------------
@functools.lru_cache(maxsize=None)
def _vmem_capacity_bytes():
    try:
        cap = int(getattr(pltpu.get_tpu_info(), "vmem_capacity_bytes", 0))
        if cap > 0:
            return cap
    except Exception:
        pass
    return 64 * 1024 * 1024          # conservative fallback (v7x per-TC VMEM)


def _vmem_limit_bytes():
    # generation-aware scoped-VMEM limit: ~96 MiB on v5e/v6e, ~48 MiB on v7x
    return int(_vmem_capacity_bytes() * 3 // 4)


def _tile_budget_bytes():
    # what tile selection may spend on resident + double-buffered blocks
    return int(_vmem_capacity_bytes() * 6 // 10)


@functools.lru_cache(maxsize=None)
def _prefer_two_batch_shards():
    """v7x has 2 TensorCores per chip: keep >= 2 blocks on the 'parallel' axis."""
    try:
        kind = jax.devices()[0].device_kind.lower()
        return "v7" in kind
    except Exception:
        return False


# --------------------------- tile selection ----------------------------------
def _divisors(n):
    ds = set()
    i = 1
    while i * i <= n:
        if n % i == 0:
            ds.add(i)
            ds.add(n // i)
        i += 1
    return sorted(ds, reverse=True)


def _round_up(x, m):
    return ((x + m - 1) // m) * m


def _pick_row_tile(B, row_bytes, target_bytes=4 << 20):
    """Batch tile sized by BYTES (~target per block), dividing B, multiple of 8
    where possible.  Avoids both tiny blocks (per-step overhead, short DMAs)
    and unbounded full-batch blocks."""
    cands = [d for d in _divisors(B) if d % 8 == 0]
    if not cands:
        return B                      # small / odd batch: full dim is always legal
    want = max(8, target_bytes // max(row_bytes, 1))
    fit = [d for d in cands if d <= want]
    return max(fit) if fit else min(cands)


def _k_tile_candidates(K):
    cands = [d for d in _divisors(K) if d % _LANE == 0]
    if K not in cands:
        cands = [K] + cands           # full-K block is always legal
    return cands                      # descending


def _matmul_footprint(tm, tk, n_pad, w_item, x_item, out_item, n_inputs):
    """VMEM bytes for one grid step, including double buffering, the f32
    accumulator scratch and the bias (previous version under-counted)."""
    return (2 * tk * n_pad * w_item            # weight tile (double-buffered)
            + 2 * n_inputs * tm * tk * x_item  # input tile(s) (double-buffered)
            + 2 * tm * n_pad * out_item        # output tile (double-buffered)
            + tm * n_pad * 4                   # f32 accumulator scratch
            + 2 * n_pad * 4)                   # bias


def _pick_tensor_tiles(B, K, n_pad, w_item, x_item, out_item, budget):
    """'tensor' is weight-DMA bound: stream the whole (K, N) weight as few
    times as possible -> largest tm that fits.  On v7x prefer tm = B/2 so the
    'parallel' batch axis has 2 blocks (one per TensorCore)."""
    tm_cands = [d for d in _divisors(B) if d % 8 == 0]
    if not tm_cands:
        tm_cands = [B]
    order = []
    if _prefer_two_batch_shards() and B % 2 == 0 and (B // 2) in tm_cands:
        order.append(B // 2)
    for t in tm_cands:                # descending
        if t not in order:
            order.append(t)
    for tm in order:
        for tk in _k_tile_candidates(K):   # descending -> largest fitting tk
            if _matmul_footprint(tm, tk, n_pad, w_item, x_item, out_item, 2) <= budget:
                return tm, tk
    return min(tm_cands), min(_k_tile_candidates(K))


def _pick_cross_tiles(B, Dc, n_pad, w_item, x_item, out_item, budget):
    tb = _pick_row_tile(B, max(Dc, n_pad) * 4, target_bytes=2 << 20)
    for tk in _k_tile_candidates(Dc):
        if _matmul_footprint(tb, tk, n_pad, w_item, x_item, out_item, 1) <= budget:
            return tb, tk
    return tb, min(_k_tile_candidates(Dc))


# --------------------------- 'tensor' fusion ---------------------------------
# out = ReLU((x1 * x2).view(B, -1) @ W_t + b), K-tiled with a VMEM accumulator.
def _tensor_fusion_kernel(x1_ref, x2_ref, wt_ref, b_ref, o_ref, acc_ref):
    k = pl.program_id(1)

    @pl.when(k == 0)
    def _init():
        acc_ref[...] = jnp.zeros_like(acc_ref)

    w = wt_ref[...]                                        # (tk, Np)
    prod = (x1_ref[...] * x2_ref[...]).astype(w.dtype)     # f32 product, cast for MXU
    acc_ref[...] += jnp.dot(prod, w, preferred_element_type=jnp.float32)

    @pl.when(k == pl.num_programs(1) - 1)
    def _finalize():
        y = acc_ref[...] + b_ref[...].astype(jnp.float32)
        o_ref[...] = jnp.maximum(y, 0.0).astype(o_ref.dtype)


def _tensor_fusion(x1, x2, wt, b, out_dim, *, tm=None, tk=None):
    B = x1.shape[0]
    K, Np = wt.shape                  # Np = lane-padded output width
    x1f = x1.reshape(B, K)            # glue: PyTorch .view(B, -1)
    x2f = x2.reshape(B, K)
    sel_tm, sel_tk = _pick_tensor_tiles(
        B, K, Np, wt.dtype.itemsize, x1.dtype.itemsize, x1.dtype.itemsize,
        _tile_budget_bytes())
    tm = sel_tm if tm is None else tm
    tk = sel_tk if tk is None else tk
    grid = (B // tm, K // tk)
    out = pl.pallas_call(
        _tensor_fusion_kernel,
        out_shape=jax.ShapeDtypeStruct((B, Np), x1.dtype),
        grid=grid,
        in_specs=[
            pl.BlockSpec((tm, tk), lambda i, k: (i, k)),
            pl.BlockSpec((tm, tk), lambda i, k: (i, k)),
            pl.BlockSpec((tk, Np), lambda i, k: (k, 0)),
            pl.BlockSpec((1, Np), lambda i, k: (0, 0)),
        ],
        out_specs=pl.BlockSpec((tm, Np), lambda i, k: (i, 0)),
        scratch_shapes=[pltpu.VMEM((tm, Np), jnp.float32)],
        compiler_params=pltpu.CompilerParams(
            dimension_semantics=("parallel", "arbitrary"),
            vmem_limit_bytes=_vmem_limit_bytes(),
        ),
    )(x1f, x2f, wt, b)
    return out if Np == out_dim else out[:, :out_dim]


# --------------------------- 'cross' fusion ----------------------------------
# Seq-len-1 attention: softmax over the single key position == 1, so the
# output equals out_proj(V(x2)); V/out projections are pre-fused offline.
# K-tiled so the (D, D) weight never has to fit VMEM in one block.
def _cross_kernel(x2_ref, w_ref, b_ref, o_ref, acc_ref):
    k = pl.program_id(1)

    @pl.when(k == 0)
    def _init():
        acc_ref[...] = jnp.zeros_like(acc_ref)

    w = w_ref[...]
    acc_ref[...] += jnp.dot(x2_ref[...].astype(w.dtype), w,
                            preferred_element_type=jnp.float32)

    @pl.when(k == pl.num_programs(1) - 1)
    def _finalize():
        o_ref[...] = (acc_ref[...] + b_ref[...].astype(jnp.float32)).astype(o_ref.dtype)


def _cross(params, x1, x2):
    del x1                                  # query does not affect the output
    B, Dc = x2.shape
    w = params["cross_w_fused"]             # (Dc, Np) bf16, lane-padded columns
    b = params["cross_b_fused"]             # (1, Np)  f32
    Np = w.shape[1]
    tb, tk = _pick_cross_tiles(B, Dc, Np, w.dtype.itemsize,
                               x2.dtype.itemsize, x2.dtype.itemsize,
                               _tile_budget_bytes())
    grid = (B // tb, Dc // tk)
    out = pl.pallas_call(
        _cross_kernel,
        out_shape=jax.ShapeDtypeStruct((B, Np), x2.dtype),
        grid=grid,
        in_specs=[
            pl.BlockSpec((tb, tk), lambda i, k: (i, k)),
            pl.BlockSpec((tk, Np), lambda i, k: (k, 0)),
            pl.BlockSpec((1, Np), lambda i, k: (0, 0)),
        ],
        out_specs=pl.BlockSpec((tb, Np), lambda i, k: (i, 0)),
        scratch_shapes=[pltpu.VMEM((tb, Np), jnp.float32)],
        compiler_params=pltpu.CompilerParams(
            dimension_semantics=("parallel", "arbitrary"),
            vmem_limit_bytes=_vmem_limit_bytes(),
        ),
    )(x2, w, b)
    return out if Np == Dc else out[:, :Dc]


# --------------------------- 'weighted' fusion -------------------------------
# Softmax of the 2-element weight vector runs in the wrapper; the kernel is a
# pure VPU axpy with the two mixing scalars delivered via SMEM.
def _weighted_kernel(w_ref, x1_ref, x2_ref, o_ref):
    w0 = w_ref[0]
    w1 = w_ref[1]
    o_ref[...] = (w0 * x1_ref[...] + w1 * x2_ref[...]).astype(o_ref.dtype)


def _weighted(weights, x1, x2):
    B, D = x1.shape
    w = jax.nn.softmax(weights.astype(jnp.float32))        # shape (2,)
    tb = _pick_row_tile(B, D * x1.dtype.itemsize, target_bytes=4 << 20)
    return pl.pallas_call(
        _weighted_kernel,
        out_shape=jax.ShapeDtypeStruct((B, D), x1.dtype),
        grid=(B // tb,),
        in_specs=[
            pl.BlockSpec(memory_space=pltpu.MemorySpace.SMEM),
            pl.BlockSpec((tb, D), lambda i: (i, 0)),
            pl.BlockSpec((tb, D), lambda i: (i, 0)),
        ],
        out_specs=pl.BlockSpec((tb, D), lambda i: (i, 0)),
        compiler_params=pltpu.CompilerParams(
            dimension_semantics=("parallel",),
            vmem_limit_bytes=_vmem_limit_bytes(),
        ),
    )(w, x1, x2)


# --------------------------- 'concat' fusion ---------------------------------
# B-tiled: each grid step writes one lane-dense (tb, 2D) output block.
def _concat_kernel(x1_ref, x2_ref, o_ref):
    d = x1_ref.shape[1]
    o_ref[:, :d] = x1_ref[...]
    o_ref[:, d:] = x2_ref[...]


def _concat(x1, x2):
    if x1.shape != x2.shape or x1.dtype != x2.dtype or x1.shape[1] % _LANE != 0:
        # Unaligned lane split / mismatched operands: pure data movement,
        # XLA's concatenate already hits the HBM roofline.
        return jnp.concatenate([x1, x2], axis=1)
    B, D = x1.shape
    tb = _pick_row_tile(B, 2 * D * x1.dtype.itemsize, target_bytes=4 << 20)
    return pl.pallas_call(
        _concat_kernel,
        out_shape=jax.ShapeDtypeStruct((B, 2 * D), x1.dtype),
        grid=(B // tb,),
        in_specs=[pl.BlockSpec((tb, D), lambda i: (i, 0)),
                  pl.BlockSpec((tb, D), lambda i: (i, 0))],
        out_specs=pl.BlockSpec((tb, 2 * D), lambda i: (i, 0)),
        compiler_params=pltpu.CompilerParams(
            dimension_semantics=("parallel",),
            vmem_limit_bytes=_vmem_limit_bytes(),
        ),
    )(x1, x2)


# --------------------------- parameter init ----------------------------------
def init_params(key, input_dim,
                tensor_weight_dtype=jnp.bfloat16,
                cross_weight_dtype=jnp.bfloat16):
    D = input_dim
    Np = _round_up(D, _LANE)          # lane-padded output width (stripped in wrapper)
    hi = jax.lax.Precision.HIGHEST
    k1, k2, k3, k4, k5 = jax.random.split(key, 5)
    params = {"input_dim": D}

    # tensor: Linear(D*D, D) (+ ReLU applied in-kernel)
    lim = 1.0 / np.sqrt(D * D)
    w = jax.random.uniform(k1, (D, D * D), jnp.float32, -lim, lim)    # torch (out, in)
    b = jax.random.uniform(k2, (D,), jnp.float32, -lim, lim)
    wt = jnp.transpose(w)                                             # (D*D, D)
    params["_tensor_w_f32"] = wt                                      # reference only
    params["tensor_wt"] = jnp.pad(wt, ((0, 0), (0, Np - D))).astype(tensor_weight_dtype)
    params["tensor_b"] = jnp.pad(b, (0, Np - D)).reshape(1, Np)

    # weighted: nn.Parameter(torch.ones(2))
    params["weights"] = jnp.ones((2,), jnp.float32)

    # cross: nn.MultiheadAttention(embed_dim=D, num_heads=8, batch_first=True)
    lim2 = 1.0 / np.sqrt(D)
    in_proj_w = jax.random.uniform(k3, (3 * D, D), jnp.float32, -lim2, lim2)
    in_proj_b = jax.random.uniform(k4, (3 * D,), jnp.float32, -lim2, lim2)
    wv, bv = in_proj_w[2 * D:], in_proj_b[2 * D:]     # q/k never reach the kernel
    out_w = jax.random.uniform(k5, (D, D), jnp.float32, -lim2, lim2)  # torch (out, in)
    bo = jnp.zeros((D,), jnp.float32)                 # MHA out_proj bias init = 0
    wv_t, wo_t = jnp.transpose(wv), jnp.transpose(out_w)
    w_fused = jnp.dot(wv_t, wo_t, precision=hi)                       # (D, D)
    b_fused = jnp.dot(bv.reshape(1, D), wo_t, precision=hi) + bo.reshape(1, D)
    params["cross_w_fused"] = jnp.pad(w_fused, ((0, 0), (0, Np - D))).astype(cross_weight_dtype)
    params["cross_b_fused"] = jnp.pad(b_fused, ((0, 0), (0, Np - D)))
    # f32 pieces kept only for the reference checks in __main__
    params["_wv_t"], params["_bv"] = wv_t, bv.reshape(1, D)
    params["_wo_t"], params["_bo"] = wo_t, bo.reshape(1, D)
    return params


# --------------------------- module forward ----------------------------------
def fusion_forward(method, params, x1, x2=None):
    method = method.lower()
    if method in ("none", "identity"):
        return x1
    if x2 is None:
        x2 = x1                        # torch: x2 = x1.clone()
    if method == "concat":
        return _concat(x1, x2)
    elif method == "tensor":
        return _tensor_fusion(x1, x2, params["tensor_wt"], params["tensor_b"],
                              params["input_dim"])
    elif method == "weighted":
        return _weighted(params["weights"], x1, x2)
    elif method == "cross":
        return _cross(params, x1, x2)
    else:
        raise ValueError(f"Unsupported fusion method: {method}")


if __name__ == "__main__":
    B, D = 2, 32                       # D divisible by num_heads=8
    key = jax.random.PRNGKey(0)
    kp, kx1, kx2, kt1, kt2, kc1, kc2 = jax.random.split(key, 7)
    params = init_params(kp, D)
    Np = params["tensor_b"].shape[1]

    x1 = jax.random.normal(kx1, (B, D), jnp.float32)
    x2 = jax.random.normal(kx2, (B, D), jnp.float32)
    t1 = jax.random.normal(kt1, (B, D, D), jnp.float32)   # 'tensor' method inputs
    t2 = jax.random.normal(kt2, (B, D, D), jnp.float32)
    # lane-aligned inputs to exercise the Pallas concat path (D % 128 == 0)
    xc1 = jax.random.normal(kc1, (B, 128), jnp.float32)
    xc2 = jax.random.normal(kc2, (B, 128), jnp.float32)

    outs = {
        "none": fusion_forward("none", params, x1, x2),
        "concat": fusion_forward("concat", params, x1, x2),
        "concat_aligned": fusion_forward("concat", params, xc1, xc2),
        "weighted": fusion_forward("weighted", params, x1, x2),
        "weighted_self": fusion_forward("weighted", params, x1),     # x2=None path
        "tensor": fusion_forward("tensor", params, t1, t2),
        "cross": fusion_forward("cross", params, x1, x2),
    }
    # exercise the multi-K-tile accumulator path and the f32-weight path
    outs["tensor_ktiled"] = _tensor_fusion(
        t1, t2, params["tensor_wt"], params["tensor_b"], D, tk=256)
    wt_f32_padded = jnp.pad(params["_tensor_w_f32"], ((0, 0), (0, Np - D)))
    outs["tensor_f32w"] = _tensor_fusion(t1, t2, wt_f32_padded, params["tensor_b"], D)
    outs = jax.block_until_ready(outs)

    # ---------------- correctness checks vs plain-JAX references -------------
    hi = jax.lax.Precision.HIGHEST
    np.testing.assert_allclose(np.asarray(outs["none"]), np.asarray(x1))
    np.testing.assert_allclose(np.asarray(outs["concat"]),
                               np.asarray(jnp.concatenate([x1, x2], axis=1)), rtol=1e-6)
    np.testing.assert_allclose(np.asarray(outs["concat_aligned"]),
                               np.asarray(jnp.concatenate([xc1, xc2], axis=1)), rtol=1e-6)

    w_sm = jax.nn.softmax(params["weights"])
    np.testing.assert_allclose(np.asarray(outs["weighted"]),
                               np.asarray(w_sm[0] * x1 + w_sm[1] * x2),
                               rtol=1e-5, atol=1e-6)
    np.testing.assert_allclose(np.asarray(outs["weighted_self"]), np.asarray(x1),
                               rtol=1e-5, atol=1e-6)

    # tensor: tight check vs bf16-rounded reference, loose check vs exact f32 math
    prod = (t1 * t2).reshape(B, -1)
    b_t = params["tensor_b"][:, :D]
    wt_bf_up = params["tensor_wt"][:, :D].astype(jnp.float32)
    ref_t_bf = jnp.maximum(
        jnp.dot(prod.astype(jnp.bfloat16).astype(jnp.float32), wt_bf_up, precision=hi)
        + b_t, 0.0)
    ref_t_f32 = jnp.maximum(
        jnp.dot(prod, params["_tensor_w_f32"], precision=hi) + b_t, 0.0)
    np.testing.assert_allclose(np.asarray(outs["tensor"]), np.asarray(ref_t_bf),
                               rtol=2e-3, atol=1e-5)
    np.testing.assert_allclose(np.asarray(outs["tensor_ktiled"]), np.asarray(ref_t_bf),
                               rtol=2e-3, atol=1e-5)
    np.testing.assert_allclose(np.asarray(outs["tensor"]), np.asarray(ref_t_f32),
                               rtol=5e-2, atol=2e-3)
    np.testing.assert_allclose(np.asarray(outs["tensor_f32w"]), np.asarray(ref_t_f32),
                               rtol=5e-2, atol=2e-3)

    # cross: seq-len-1 attention == out_proj(V) exactly (kernel uses bf16 weight)
    x2_bf = x2.astype(jnp.bfloat16).astype(jnp.float32)
    w_c_up = params["cross_w_fused"][:, :D].astype(jnp.float32)
    ref_c_bf = jnp.dot(x2_bf, w_c_up, precision=hi) + params["cross_b_fused"][:, :D]
    v = jnp.dot(x2, params["_wv_t"], precision=hi) + params["_bv"]
    ref_c = jnp.dot(v, params["_wo_t"], precision=hi) + params["_bo"]
    np.testing.assert_allclose(np.asarray(outs["cross"]), np.asarray(ref_c_bf),
                               rtol=2e-3, atol=1e-4)
    np.testing.assert_allclose(np.asarray(outs["cross"]), np.asarray(ref_c),
                               rtol=5e-2, atol=2e-2)

    print("KERNEL_OK")
</pallas_src>

<mosaic_0001>
module attributes {stable_mosaic.version = 11 : i64} {
  func.func @_concat_kernel(%arg0: i32, %arg1: memref<2x128xf32, #tpu.memory_space<vmem>>, %arg2: memref<2x128xf32, #tpu.memory_space<vmem>>, %arg3: memref<2x256xf32, #tpu.memory_space<vmem>>) attributes {dimension_semantics = [#tpu.dimension_semantics<parallel>], iteration_bounds = array<i64: 1>, scalar_prefetch = 0 : i64, scratch_operands = 0 : i64, tpu.core_type = #tpu.core_type<tc>, window_params = [{transform_indices = @transform_0, window_bounds = array<i64: 2, 128>}, {transform_indices = @transform_1, window_bounds = array<i64: 2, 128>}, {transform_indices = @transform_2, window_bounds = array<i64: 2, 256>}]} {
    %c0 = arith.constant 0 : index
    %c0_0 = arith.constant 0 : index
    %0 = vector.load %arg1[%c0, %c0_0] : memref<2x128xf32, #tpu.memory_space<vmem>>, vector<2x128xf32>
    %c0_1 = arith.constant 0 : index
    %c0_2 = arith.constant 0 : index
    %1 = vector.load %arg3[%c0_1, %c0_2] : memref<2x256xf32, #tpu.memory_space<vmem>>, vector<2x128xf32>
    tpu.vector_store %arg3[%c0_1, %c0_2], %0 {strides = array<i32>} : memref<2x256xf32, #tpu.memory_space<vmem>>, vector<2x128xf32>,
    %c0_3 = arith.constant 0 : index
    %c0_4 = arith.constant 0 : index
    %2 = vector.load %arg2[%c0_3, %c0_4] : memref<2x128xf32, #tpu.memory_space<vmem>>, vector<2x128xf32>
    %c0_5 = arith.constant 0 : index
    %c128 = arith.constant 128 : index
    %3 = vector.load %arg3[%c0_5, %c128] : memref<2x256xf32, #tpu.memory_space<vmem>>, vector<2x128xf32>
    tpu.vector_store %arg3[%c0_5, %c128], %2 {strides = array<i32>} : memref<2x256xf32, #tpu.memory_space<vmem>>, vector<2x128xf32>,
    return
  }
  func.func @transform_0(%arg0: i32) -> (i32, i32) {
    %c0_i32 = arith.constant 0 : i32
    %c0_i32_0 = arith.constant 0 : i32
    return %arg0, %c0_i32 : i32, i32
  }
  func.func @transform_1(%arg0: i32) -> (i32, i32) {
    %c0_i32 = arith.constant 0 : i32
    %c0_i32_0 = arith.constant 0 : i32
    return %arg0, %c0_i32 : i32, i32
  }
  func.func @transform_2(%arg0: i32) -> (i32, i32) {
    %c0_i32 = arith.constant 0 : i32
    %c0_i32_0 = arith.constant 0 : i32
    return %arg0, %c0_i32 : i32, i32
  }
}

</mosaic_0001>

<bundles_post_ra>
// kernel: tpu_custom_call.1
= control target key start
LH: loop header
LB: loop body
LE: loop exit
PB: predicated region body
PF: predicated region fallthrough
CT: control target
= control target key end

     0   :  { %7 = vsyncpa [#allocation3], 0  ;;  %s170_s0 = inlined_call_operand.hbm [shape: f32[2,128], index: 0, kind: input, shape index: {}]   ;;  %s171_s1 = inlined_call_operand.hbm [shape: f32[2,128], index: 1, kind: input, shape index: {}]   ;;  %s172_s2 = inlined_call_operand.hbm [shape: f32[2,256], index: 2, kind: output, shape index: {}]  }
   0x1   :  { %8 = vsyncpa [#allocation6], 0 }
   0x2   :  { %9 = vsyncpa [#allocation4], 0  ;;  %s15_s11 = sshll.u32 %s170_s0, 4  ;;  %s143_s12 = smov [#allocation2]   ;;  %s16_s11 = int_to_ptr.hbm [resolvable:$true] %s15_s11 }
   0x3   :  { %s17_s13 = sshll.u32 %s143_s12, 4  ;;  %s26_s16 = sshll.u32 %s171_s1, 4  ;;  %s18_s13 = int_to_ptr.vmem [resolvable:$true] %s17_s13  ;;  %s27_s16 = int_to_ptr.hbm [resolvable:$true] %s26_s16 }
   0x4   :  { %20 = dma.hbm_to_vmem [thread:$0]  %s16_s11, 32, %s18_s13, [#allocation3]  }
   0x5   :  { %s144_s17 = smov [#allocation5]  }
   0x6   :  { %s28_s18 = sshll.u32 %s144_s17, 4  ;;  %s29_s18 = int_to_ptr.vmem [resolvable:$true] %s28_s18 }
   0x7   :  { %31 = dma.hbm_to_vmem [thread:$0]  %s27_s16, 32, %s29_s18, [#allocation6]  }
   0x8   :  { %137 = dma.done.wait [#allocation3], 32  }
   0x9   :  { %138 = vsyncadd [#allocation3], 4294967264 }
   0xa   :  { %139 = dma.done.wait [#allocation6], 32  }
   0xb   :  { %140 = vsyncadd [#allocation6], 4294967264  ;;  %s145_s19 = smov [#allocation7]   ;;  %s51_s22 = sshll.u32 %s172_s2, 4  ;;  %v40_v0 = vld [vmem:[#allocation2] sm:$0x3]  ;;  %s52_s22 = int_to_ptr.hbm [resolvable:$true] %s51_s22 }
   0xc   :  { %s49_s0 = sshll.u32 %s145_s19, 4  ;;  %v42_v1 = vld [vmem:[#allocation5] sm:$0x3]  ;;  %41 = vst [vmem:[#allocation7] sm:$0x3] %v40_v0  ;;  %s50_s0 = int_to_ptr.vmem [resolvable:$true] %s49_s0 }
   0xd   :  { %43 = vst [vmem:[#allocation7 + $0x2] sm:$0x3] %v42_v1 }
   0xe   :  { %54 = dma.vmem_to_hbm [thread:$0]  %s50_s0, 64, %s52_s22, [#allocation4]  }
   0xf   :  { %141 = dma.done.wait [#allocation4], 64  }
  0x10   :  { %142 = vsyncadd [#allocation4], 4294967232 }
  0x11   :  { %59 = vsyncpa [#allocation3], 1 }
  0x12   :  { %60 = vsyncpa [#allocation6], 1 }
  0x13   :  { %61 = vsyncpa [#allocation4], 1 }

</bundles_post_ra>
